<compile_context>
chip_gen: v7x
topology: tpu7x:2x2x1
jax: 0.10.0
libtpu: 0.0.40
codegen_flags: <defaults>
</compile_context>

<pallas_src>
import jax
import jax.numpy as jnp
from jax.experimental import pallas as pl
from jax.experimental.pallas import tpu as pltpu


def _vilt_embed_kernel(patches_ref, w_ref, add_ref, out_ref):
    # patches_ref: (Bt, N+1, CPP) bf16 -- row 0 of every batch element is zeros
    # w_ref:       (CPP, H)       bf16 -- conv weight, reshaped/transposed
    # add_ref:     (N+1, H)       f32  -- cls/pos/bias/type folded into one table
    # out_ref:     (Bt, N+1, H)   f32
    y = jnp.einsum(
        "bnc,ch->bnh", patches_ref[...], w_ref[...],
        preferred_element_type=jnp.float32,
    )                                                   # MXU, f32 accumulate
    out_ref[...] = (y + add_ref[...]).astype(out_ref.dtype)  # one full-block store


def _pick_block_batch(B, per_elem_bytes, budget_bytes=4 << 20):
    """Largest divisor of B whose patch tile fits `budget_bytes`; keep >= 2
    grid steps whenever B > 1 (pipelining + v7x megacore sharding)."""
    cap = max(1, budget_bytes // max(per_elem_bytes, 1))
    if B > 1:
        cap = min(cap, B // 2)
    bt = 1
    for d in range(1, B + 1):
        if B % d == 0 and d <= cap:
            bt = d
    return bt


def vilt_image_embedding(image, params):
    """image: (B, C, H, W) float32 (NCHW, as in PyTorch), or (B, F, C, H, W)."""
    if image.ndim == 5:  # video frames: match torch permute(1,0,...).flatten(0,1)
        image = jnp.transpose(image, (1, 0, 2, 3, 4)).reshape(-1, *image.shape[2:])

    B, C, H, W = image.shape
    P = params["patch_size"]
    hidden = params["conv_b"].shape[0]
    assert H % P == 0 and W % P == 0
    nh, nw = H // P, W // P
    N = nh * nw
    CPP = C * P * P

    # --- glue: patch extraction (pure layout work, done in bf16 to halve the
    # relayout traffic), plus a zero cls-row prepend so the kernel emits the
    # full (N+1)-token sequence with a single matmul/store. ---
    img16 = image.astype(jnp.bfloat16)
    patches = img16.reshape(B, C, nh, P, nw, P)
    patches = patches.transpose(0, 2, 4, 1, 3, 5).reshape(B, N, CPP)
    patches = jnp.pad(patches, ((0, 0), (1, 0), (0, 0)))          # (B, N+1, CPP)

    # conv weight (hidden, C, P, P) -> (C*P*P, hidden), bf16 operand.
    w = params["conv_w"].astype(jnp.bfloat16).reshape(hidden, CPP).T

    # One additive table: row 0 = cls + pos[0] + type ; rows 1..N = bias + pos[1:] + type.
    # (conv bias folded ONLY into the patch rows, never the cls row.)
    pos = params["pos_embed"].reshape(N + 1, hidden).astype(jnp.float32)
    type_row = params["token_type"][1].reshape(1, hidden).astype(jnp.float32)
    cls_tok = params["cls_token"].reshape(1, hidden).astype(jnp.float32)
    bias = params["conv_b"].reshape(1, hidden).astype(jnp.float32)
    add = jnp.concatenate(
        [cls_tok + pos[0:1] + type_row, bias + pos[1:] + type_row], axis=0
    )                                                             # (N+1, H) f32

    Bt = _pick_block_batch(B, (N + 1) * CPP * 2)
    grid = (B // Bt,)

    out = pl.pallas_call(
        _vilt_embed_kernel,
        out_shape=jax.ShapeDtypeStruct((B, N + 1, hidden), jnp.float32),
        grid_spec=pltpu.PrefetchScalarGridSpec(
            num_scalar_prefetch=0,
            grid=grid,
            in_specs=[
                pl.BlockSpec((Bt, N + 1, CPP), lambda bi: (bi, 0, 0)),
                pl.BlockSpec((CPP, hidden), lambda bi: (0, 0)),
                pl.BlockSpec((N + 1, hidden), lambda bi: (0, 0)),
            ],
            out_specs=pl.BlockSpec((Bt, N + 1, hidden), lambda bi: (bi, 0, 0)),
        ),
        compiler_params=pltpu.CompilerParams(dimension_semantics=("parallel",)),
    )(patches, w, add)
    return out


def _reference(image, params):
    """Plain-JAX f32 reference of the same forward for a sanity check."""
    B, C, H, W = image.shape
    P = params["patch_size"]
    hidden = params["conv_b"].shape[0]
    nh, nw = H // P, W // P
    N = nh * nw
    patches = image.reshape(B, C, nh, P, nw, P).transpose(0, 2, 4, 1, 3, 5).reshape(B, N, -1)
    w = params["conv_w"].reshape(hidden, -1).T
    y = patches @ w + params["conv_b"][None, None, :]
    cls_tok = jnp.broadcast_to(params["cls_token"].reshape(1, 1, hidden), (B, 1, hidden))
    emb = jnp.concatenate([cls_tok, y], axis=1)
    emb = emb + params["pos_embed"].reshape(1, N + 1, hidden)
    emb = emb + params["token_type"][1][None, None, :]
    return emb


def make_params(key, *, num_channels, patch_size, image_size, hidden_size):
    n_patches = (image_size // patch_size) ** 2
    ks = jax.random.split(key, 5)
    scale = 0.02
    return {
        "patch_size": patch_size,
        "conv_w": scale * jax.random.normal(
            ks[0], (hidden_size, num_channels, patch_size, patch_size), jnp.float32),
        "conv_b": scale * jax.random.normal(ks[1], (hidden_size,), jnp.float32),
        "cls_token": scale * jax.random.normal(ks[2], (1, 1, hidden_size), jnp.float32),
        "pos_embed": scale * jax.random.normal(
            ks[3], (1, n_patches + 1, hidden_size), jnp.float32),
        "token_type": scale * jax.random.normal(ks[4], (2, hidden_size), jnp.float32),
    }


if __name__ == "__main__":
    key = jax.random.PRNGKey(0)
    k_img, k_par = jax.random.split(key)

    B, C, HW = 2, 4, 16        # batch, channels, spatial
    P, hidden = 4, 32          # patch size, hidden size -> seq = 16 + 1 = 17

    image = jax.random.normal(k_img, (B, C, HW, HW), jnp.float32)
    params = make_params(k_par, num_channels=C, patch_size=P,
                         image_size=HW, hidden_size=hidden)

    out = vilt_image_embedding(image, params)
    out = jax.block_until_ready(out)

    ref = _reference(image, params)
    assert out.shape == (B, (HW // P) ** 2 + 1, hidden)
    # bf16 matmul operands (f32 accumulation) -> loosened tolerance vs f32 ref.
    assert jnp.allclose(out, ref, atol=2e-2, rtol=2e-2), "mismatch vs reference"

    print("KERNEL_OK")
</pallas_src>

<mosaic_0001>
module attributes {stable_mosaic.version = 11 : i64} {
  func.func @_vilt_embed_kernel(%arg0: i32, %arg1: memref<1x17x64xbf16, #tpu.memory_space<vmem>>, %arg2: memref<64x32xbf16, #tpu.memory_space<vmem>>, %arg3: memref<17x32xf32, #tpu.memory_space<vmem>>, %arg4: memref<1x17x32xf32, #tpu.memory_space<vmem>>) attributes {dimension_semantics = [#tpu.dimension_semantics<parallel>], iteration_bounds = array<i64: 2>, scalar_prefetch = 0 : i64, scratch_operands = 0 : i64, tpu.core_type = #tpu.core_type<tc>, window_params = [{transform_indices = @transform_0, window_bounds = array<i64: 1, 17, 64>}, {pipeline_mode = #tpu.pipeline_mode<synchronous>, transform_indices = @transform_1, window_bounds = array<i64: 64, 32>}, {pipeline_mode = #tpu.pipeline_mode<synchronous>, transform_indices = @transform_2, window_bounds = array<i64: 17, 32>}, {transform_indices = @transform_3, window_bounds = array<i64: 1, 17, 32>}]} {
    %c0 = arith.constant 0 : index
    %c0_0 = arith.constant 0 : index
    %c0_1 = arith.constant 0 : index
    %0 = vector.load %arg1[%c0, %c0_0, %c0_1] : memref<1x17x64xbf16, #tpu.memory_space<vmem>>, vector<1x17x64xbf16>
    %c0_2 = arith.constant 0 : index
    %c0_3 = arith.constant 0 : index
    %1 = vector.load %arg2[%c0_2, %c0_3] : memref<64x32xbf16, #tpu.memory_space<vmem>>, vector<64x32xbf16>
    "tpu.trace_start"() <{level = 10 : i32, message = "bnc,ch->bnh"}> : () -> ()
    %cst = arith.constant dense<0.000000e+00> : vector<1x17x32xf32>
    %2 = tpu.matmul %0, %1, %cst {dimension_numbers = #tpu.dot_dimension_numbers<[2], [0], [0, 1], [1], [0, 0, 0, 1, 1, 1], [], []>} : vector<1x17x64xbf16>, vector<64x32xbf16>, vector<1x17x32xf32> -> vector<1x17x32xf32>
    "tpu.trace_stop"() : () -> ()
    %c0_4 = arith.constant 0 : index
    %c0_5 = arith.constant 0 : index
    %3 = vector.load %arg3[%c0_4, %c0_5] : memref<17x32xf32, #tpu.memory_space<vmem>>, vector<17x32xf32>
    %4 = vector.shape_cast %3 : vector<17x32xf32> to vector<1x17x32xf32>
    %5 = arith.addf %2, %4 : vector<1x17x32xf32>
    %c0_6 = arith.constant 0 : index
    %c0_7 = arith.constant 0 : index
    %c0_8 = arith.constant 0 : index
    %6 = vector.load %arg4[%c0_6, %c0_7, %c0_8] : memref<1x17x32xf32, #tpu.memory_space<vmem>>, vector<1x17x32xf32>
    tpu.vector_store %arg4[%c0_6, %c0_7, %c0_8], %5 {strides = array<i32>} : memref<1x17x32xf32, #tpu.memory_space<vmem>>, vector<1x17x32xf32>,
    return
  }
  func.func @transform_0(%arg0: i32) -> (i32, i32, i32) {
    %c0_i32 = arith.constant 0 : i32
    %c0_i32_0 = arith.constant 0 : i32
    %c0_i32_1 = arith.constant 0 : i32
    return %arg0, %c0_i32, %c0_i32_0 : i32, i32, i32
  }
  func.func @transform_1(%arg0: i32) -> (i32, i32) {
    %c0_i32 = arith.constant 0 : i32
    %c0_i32_0 = arith.constant 0 : i32
    %c0_i32_1 = arith.constant 0 : i32
    return %c0_i32, %c0_i32_0 : i32, i32
  }
  func.func @transform_2(%arg0: i32) -> (i32, i32) {
    %c0_i32 = arith.constant 0 : i32
    %c0_i32_0 = arith.constant 0 : i32
    %c0_i32_1 = arith.constant 0 : i32
    return %c0_i32, %c0_i32_0 : i32, i32
  }
  func.func @transform_3(%arg0: i32) -> (i32, i32, i32) {
    %c0_i32 = arith.constant 0 : i32
    %c0_i32_0 = arith.constant 0 : i32
    %c0_i32_1 = arith.constant 0 : i32
    return %arg0, %c0_i32, %c0_i32_0 : i32, i32, i32
  }
}

</mosaic_0001>

<bundles_post_ra>
// kernel: tpu_custom_call.1
= control target key start
LH: loop header
LB: loop body
LE: loop exit
PB: predicated region body
PF: predicated region fallthrough
CT: control target
= control target key end

     0   :  { %s412_s12 = smov 0   ;;  %s450_s0 = inlined_call_operand.vmem [shape: bf16[2,17,64], index: 0, kind: input, shape index: {}]   ;;  %s451_s1 = inlined_call_operand.vmem [shape: bf16[64,32], index: 1, kind: input, shape index: {}]   ;;  %s452_s2 = inlined_call_operand.vmem [shape: f32[17,32], index: 2, kind: input, shape index: {}]   ;;  %s453_s3 = inlined_call_operand.vmem [shape: f32[2,17,32], index: 3, kind: output, shape index: {}]  }
   0x1 LB: > { %s333_s13 = sadd.s32 4294967295, %s390_s12   ;;  %p337_p0 = scmp.ge.s32.totalorder %s390_s12, 1  ;;  %s390_s12 = sphi %s412_s12, %s13_s12  }
   0x2   : > { %p137_p1 = scmp.lt.s32.totalorder %s390_s12, 3 }
   0x4   : > { %p138_p2 = pnand %p337_p0, %p137_p1 }
   0x5   : > { %v378_v0 = vld [vmem:[%s451_s1] sm:$0xff] (!%p138_p2)   ;;  %p161_p3 = scmp.lt.s32.totalorder (!%p138_p2), %s333_s13, 1  ;;  %v379_v1 = vld [vmem:[%s451_s1 + $0x8] sm:$0xff] (!%p138_p2)   ;;  %v380_v2 = vld [vmem:[%s451_s1 + $0x10] sm:$0xff] (!%p138_p2)   ;;  %vm218_vm0 = vcmask (!%p138_p2), 523264   ;;  %vm276_vm1 = vcmask (!%p138_p2), 253952  }
   0x6   : > { %141 = sbr.rel (%p138_p2) target bundleno = 240 (0xf0), region = 32  ;;  %356 = vmatprep.subr.bf16.mxu0 (!%p138_p2), %v378_v0  ;;  %v381_v3 = vld [vmem:[%s451_s1 + $0x18] sm:$0xff] (!%p138_p2)   ;;  %v185_v6 = vld [vmem:[%s452_s2 + $0x10] sm:$0x1] (!%p138_p2)  ;;  %v183_v7 = vld [vmem:[%s452_s2] sm:$0xff] (!%p138_p2)  ;;  %vm273_vm2 = vcmask (!%p138_p2), 261120  }
   0x7   : > { %357 = vmatpush3.bf16.msra.mxu0 (!%p138_p2), %v378_v0  ;;  %v184_v11 = vld [vmem:[%s452_s2 + $0x8] sm:$0xff] (!%p138_p2) }
   0x8   : > { %358 = vmatprep.subr.bf16.mxu0 (!%p138_p2), %v379_v1 }
   0xb   : > { %359 = vmatpush3.bf16.msra.mxu0 (!%p138_p2), %v379_v1 }
   0xc   : > { %360 = vmatprep.subr.bf16.mxu0 (!%p138_p2), %v380_v2 }
   0xd   : > { %s455_s13 = smov (!%p161_p3, %s333_s13), 1 }
   0xe   : > { %s368_s20 = smul.u32 12, %s455_s13 }
   0xf   : > { %361 = vmatpush3.bf16.msra.mxu0 %v380_v2  ;;  %s369_s26 = smul.u32 24, %s455_s13 }
  0x10   : > { %s165_s23 = scalar_lea.vmem %s450_s0, %s368_s20  ;;  %362 = vmatprep.subr.bf16.mxu0 %v381_v3 }
  0x11   : > { %v382_v4 = vld [vmem:[%s165_s23] sm:$0xff]   ;;  %v383_v5 = vld [vmem:[%s165_s23 + $0x8] ss:$0 sps:$4 sm:$0x11]   ;;  %s170_s6 = scalar_lea.vmem %s453_s3, %s369_s26 }
  0x12   : > { %364 = vmatprep.mubr.msk.bf16.mxu0 %vm218_vm0, %v382_v4 }
  0x13   : > { %363 = vmatpush3.bf16.msra.mxu0 %v381_v3 }
  0x16   : > { %365 = vmatmul.mubr.msk.bf16.vlgmr.msra.gmra.mrb[0].mxu0 %vm218_vm0, %v383_v5 }
  0xe9   : > { %v366_v8 = vpop.f32.mrb[0].mxu0 }
  0xea   : > { %v268_v9 = vadd.f32 %v366_v8, %v185_v6  ;;  %v259_v10 = vpop.f32.mrb[1].mxu0 }
  0xeb   : > { %v260_v12 = vadd.f32 %v259_v10, %v183_v7  ;;  %v367_v13 = vpop.f32.mrb[2].mxu0 }
  0xec   : > { %277 = vst.msk [vmem:[%s170_s6 + $0x10] sm:$0x1] %vm276_vm1, %v268_v9  ;;  %v262_v14 = vpop.f32.mrb[3].mxu0 }
  0xed   : > { %274 = vst.msk [vmem:[%s170_s6] sm:$0xff] %vm273_vm2, %v260_v12  ;;  %v263_v15 = vadd.f32 %v262_v14, %v184_v11 }
  0xef   : > { %275 = vst.msk [vmem:[%s170_s6 + $0x8] sm:$0xff] %vm273_vm2, %v263_v15 }
  0xf0 PF: > { %s13_s12 = sadd.s32 1, %s390_s12  }
  0xf1   : > { %p10_p4 = scmp.ge.s32.totalorder %s13_s12, 4  }
  0xf3   :  { %12 = sbr.rel (!%p10_p4) target bundleno = 1 (0x1), region = 62 }

</bundles_post_ra>
